<compile_context>
chip_gen: v7x
topology: tpu7x:2x2x1
jax: 0.10.0
libtpu: 0.0.40
codegen_flags: <defaults>
</compile_context>

<pallas_src>
import functools

import jax
import jax.numpy as jnp
from jax import lax
from jax.experimental import pallas as pl
from jax.experimental.pallas import tpu as pltpu


# ---------------------------------------------------------------------------
# Kernel 1: per-block BN statistics (block sum + block-centered sum of squares)
# ---------------------------------------------------------------------------
def _stats_kernel(x_ref, w_ref, bsum_ref, bm2_ref, *, S, ts):
    s = pl.program_id(1)
    x = x_ref[0]                                   # (K, ts)
    w = w_ref[...]                                 # (Cout, K)
    acc = jnp.dot(w, x, preferred_element_type=jnp.float32)     # (Cout, ts)

    lane = lax.broadcasted_iota(jnp.int32, (1, ts), 1)
    valid = (s * ts + lane) < S                                  # (1, ts)
    count = jnp.minimum(ts, S - s * ts).astype(jnp.float32)

    acc_m = jnp.where(valid, acc, 0.0)
    bsum = jnp.sum(acc_m, axis=1, keepdims=True)                 # (Cout, 1)
    bmean = bsum / count
    diff = jnp.where(valid, acc - bmean, 0.0)
    bm2 = jnp.sum(diff * diff, axis=1, keepdims=True)            # (Cout, 1)

    cout = bsum.shape[0]
    bsum_ref[...] = bsum.reshape(1, 1, cout, 1)
    bm2_ref[...] = bm2.reshape(1, 1, cout, 1)


# ---------------------------------------------------------------------------
# Kernel 2: conv matmul + folded BN affine + ReLU, channel-major output
# ---------------------------------------------------------------------------
def _conv_bn_relu_kernel(x_ref, w_ref, scale_ref, shift_ref, o_ref):
    x = x_ref[0]                                   # (K, ts)
    w = w_ref[...]                                 # (Cout, K)
    acc = jnp.dot(w, x, preferred_element_type=jnp.float32)     # (Cout, ts)
    res = jnp.maximum(acc * scale_ref[...] + shift_ref[...], 0.0)
    o_ref[...] = res[None].astype(o_ref.dtype)     # (1, Cout, ts)


def conv_downsample_3d(x, weight, bias, gamma, beta, *,
                       do_batch_norm=True, eps=1e-5,
                       target_ts=1024, vmem_budget_bytes=12 << 20,
                       compute_dtype=jnp.float32):
    """Forward pass of ConvolutionDownsample3D.

    x:      (N, C_in, D, H, W)  float32
    weight: (C_out, C_in, 1, 2, 2)
    bias:   (C_out,) or None
    gamma, beta: (C_out,) BatchNorm affine parameters
    returns (N, C_out, D, H//2, W//2)

    compute_dtype=jnp.bfloat16 halves the dominant HBM read traffic at the
    cost of bf16 precision on the conv inputs (accumulation stays f32).
    """
    N, C, D, H, W = x.shape
    Cout = weight.shape[0]
    Ho, Wo = H // 2, W // 2
    S = D * Ho * Wo                 # spatial positions per batch element
    K = C * 4
    M = N * S                       # total rows for BN statistics

    # ---- im2col -> channel-major patch matrix (N, K, S); K order (c,kh,kw) --
    # TODO(synk): this layout change still runs as one XLA transpose over the
    # input; a strided in-kernel gather from raw NCDHW had no reliably-lowering
    # Pallas formulation (lane-strided 2x de-interleave).
    xp = x.reshape(N, C, D, Ho, 2, Wo, 2).transpose(0, 1, 4, 6, 2, 3, 5)
    xm = xp.reshape(N, K, S).astype(compute_dtype)
    wT = weight.reshape(Cout, K).astype(compute_dtype)           # (Cout, K)

    # ---- spatial tile size: large, lane-dense (multiple of 128), VMEM-sized --
    itemsize = jnp.dtype(compute_dtype).itemsize
    ts_by_vmem = max(128, vmem_budget_bytes // (2 * (K + Cout) * itemsize))
    ts_limit = min(target_ts, ts_by_vmem)
    if S <= ts_limit:
        ts = S                       # single full-extent block per batch elem
    else:
        ts = max(128, (ts_limit // 128) * 128)
    SB = pl.cdiv(S, ts)
    S_pad = SB * ts
    if S_pad != S:
        xm = jnp.pad(xm, ((0, 0), (0, 0), (0, S_pad - S)))

    # ---- compiler params: explicit VMEM limit, fully parallel grid ----------
    need = (2 * ts * K * itemsize        # double-buffered input blocks
            + 2 * ts * Cout * 4          # double-buffered output blocks
            + 2 * K * Cout * itemsize    # weight
            + (2 << 20))
    vmem_limit = int(min(max(need, 32 << 20), 48 << 20))
    cparams = pltpu.CompilerParams(
        dimension_semantics=("parallel", "parallel"),
        vmem_limit_bytes=vmem_limit)

    grid = (N, SB)

    # ---- Kernel 1: partial BN statistics, combined (Chan/Welford) in JAX ----
    if do_batch_norm:
        bsum, bm2 = pl.pallas_call(
            functools.partial(_stats_kernel, S=S, ts=ts),
            out_shape=(jax.ShapeDtypeStruct((N, SB, Cout, 1), jnp.float32),
                       jax.ShapeDtypeStruct((N, SB, Cout, 1), jnp.float32)),
            grid_spec=pltpu.PrefetchScalarGridSpec(
                num_scalar_prefetch=0,
                grid=grid,
                in_specs=[pl.BlockSpec((1, K, ts), lambda n, s: (n, 0, s)),
                          pl.BlockSpec((Cout, K), lambda n, s: (0, 0))],
                out_specs=[pl.BlockSpec((1, 1, Cout, 1),
                                        lambda n, s: (n, s, 0, 0)),
                           pl.BlockSpec((1, 1, Cout, 1),
                                        lambda n, s: (n, s, 0, 0))]),
            compiler_params=cparams,
        )(xm, wT)

        counts = jnp.minimum(ts, S - jnp.arange(SB) * ts).astype(jnp.float32)
        bsum = bsum.reshape(N, SB, Cout)
        bm2 = bm2.reshape(N, SB, Cout)
        mean = jnp.sum(bsum, axis=(0, 1)) / M                    # (Cout,)
        bmean = bsum / counts[None, :, None]
        m2 = jnp.sum(bm2, axis=(0, 1)) + jnp.sum(
            counts[None, :, None] * (bmean - mean[None, None, :]) ** 2,
            axis=(0, 1))
        var = m2 / M                                             # biased var
        scale = gamma.astype(jnp.float32) / jnp.sqrt(var + eps)
        shift = beta.astype(jnp.float32) - mean * scale
        # Conv bias (if any) cancels exactly under batch normalization.
    else:
        scale = jnp.ones((Cout,), jnp.float32)
        shift = (bias if bias is not None
                 else jnp.zeros((Cout,), jnp.float32)).astype(jnp.float32)

    scale2 = scale.reshape(Cout, 1)
    shift2 = shift.reshape(Cout, 1)

    # ---- Kernel 2: conv + BN affine + ReLU, output already channel-major ----
    out_p = pl.pallas_call(
        _conv_bn_relu_kernel,
        out_shape=jax.ShapeDtypeStruct((N, Cout, S_pad), jnp.float32),
        grid_spec=pltpu.PrefetchScalarGridSpec(
            num_scalar_prefetch=0,
            grid=grid,
            in_specs=[pl.BlockSpec((1, K, ts), lambda n, s: (n, 0, s)),
                      pl.BlockSpec((Cout, K), lambda n, s: (0, 0)),
                      pl.BlockSpec((Cout, 1), lambda n, s: (0, 0)),
                      pl.BlockSpec((Cout, 1), lambda n, s: (0, 0))],
            out_specs=pl.BlockSpec((1, Cout, ts), lambda n, s: (n, 0, s))),
        compiler_params=cparams,
    )(xm, wT, scale2, shift2)

    out = out_p[:, :, :S] if S_pad != S else out_p
    return out.reshape(N, Cout, D, Ho, Wo)        # free reshape, already NCDHW


# ---------------------------------------------------------------------------
# Pure-JAX reference (for validation only).
# ---------------------------------------------------------------------------
def _reference(x, weight, bias, gamma, beta, *, do_batch_norm=True, eps=1e-5):
    out = lax.conv_general_dilated(
        x, weight, window_strides=(1, 2, 2), padding=((0, 0), (0, 0), (0, 0)),
        dimension_numbers=("NCDHW", "OIDHW", "NCDHW"))
    if bias is not None:
        out = out + bias.reshape(1, -1, 1, 1, 1)
    if do_batch_norm:
        mean = jnp.mean(out, axis=(0, 2, 3, 4), keepdims=True)
        var = jnp.mean((out - mean) ** 2, axis=(0, 2, 3, 4), keepdims=True)
        out = (out - mean) / jnp.sqrt(var + eps)
        out = out * gamma.reshape(1, -1, 1, 1, 1) + beta.reshape(1, -1, 1, 1, 1)
    return jnp.maximum(out, 0.0)


if __name__ == "__main__":
    # params.bias = False, params.batch_norm = True (typical uresnet config)
    N, Cin, Cout, D, H, W = 2, 4, 8, 4, 16, 16

    key = jax.random.PRNGKey(0)
    kx, kw, kb = jax.random.split(key, 3)
    x = jax.random.normal(kx, (N, Cin, D, H, W), jnp.float32)
    # Conv3d weight shape: (out_channels, in_channels, 1, 2, 2)
    weight = jax.random.normal(kw, (Cout, Cin, 1, 2, 2), jnp.float32) * 0.1
    gamma = jnp.ones((Cout,), jnp.float32)   # PyTorch BatchNorm3d default init
    beta = jnp.zeros((Cout,), jnp.float32)

    # --- batch_norm=True, bias=False path ---
    out = conv_downsample_3d(x, weight, None, gamma, beta, do_batch_norm=True)
    out = jax.block_until_ready(out)
    ref = _reference(x, weight, None, gamma, beta, do_batch_norm=True)
    assert out.shape == (N, Cout, D, H // 2, W // 2), out.shape
    assert jnp.allclose(out, ref, rtol=1e-4, atol=1e-4), float(
        jnp.max(jnp.abs(out - ref)))

    # --- batch_norm=False, bias=True path ---
    bias = jax.random.normal(kb, (Cout,), jnp.float32) * 0.1
    out2 = conv_downsample_3d(x, weight, bias, gamma, beta, do_batch_norm=False)
    out2 = jax.block_until_ready(out2)
    ref2 = _reference(x, weight, bias, gamma, beta, do_batch_norm=False)
    assert jnp.allclose(out2, ref2, rtol=1e-4, atol=1e-4), float(
        jnp.max(jnp.abs(out2 - ref2)))

    print("KERNEL_OK")
</pallas_src>

<mosaic_0001>
module attributes {stable_mosaic.version = 11 : i64} {
  func.func @_stats_kernel(%arg0: i32, %arg1: i32, %arg2: memref<1x16x256xf32, #tpu.memory_space<vmem>>, %arg3: memref<8x16xf32, #tpu.memory_space<vmem>>, %arg4: memref<1x1x8x1xf32, #tpu.memory_space<vmem>>, %arg5: memref<1x1x8x1xf32, #tpu.memory_space<vmem>>) attributes {dimension_semantics = [#tpu.dimension_semantics<parallel>, #tpu.dimension_semantics<parallel>], iteration_bounds = array<i64: 2, 1>, scalar_prefetch = 0 : i64, scratch_operands = 0 : i64, tpu.core_type = #tpu.core_type<tc>, window_params = [{transform_indices = @transform_0, window_bounds = array<i64: 1, 16, 256>}, {pipeline_mode = #tpu.pipeline_mode<synchronous>, transform_indices = @transform_1, window_bounds = array<i64: 8, 16>}, {transform_indices = @transform_2, window_bounds = array<i64: 1, 1, 8, 1>}, {transform_indices = @transform_3, window_bounds = array<i64: 1, 1, 8, 1>}]} {
    %c0 = arith.constant 0 : index
    %c0_0 = arith.constant 0 : index
    %c0_1 = arith.constant 0 : index
    %0 = vector.load %arg2[%c0, %c0_0, %c0_1] : memref<1x16x256xf32, #tpu.memory_space<vmem>>, vector<1x16x256xf32>
    %1 = vector.shape_cast %0 : vector<1x16x256xf32> to vector<16x256xf32>
    %c0_2 = arith.constant 0 : index
    %c0_3 = arith.constant 0 : index
    %2 = vector.load %arg3[%c0_2, %c0_3] : memref<8x16xf32, #tpu.memory_space<vmem>>, vector<8x16xf32>
    %cst = arith.constant dense<0.000000e+00> : vector<8x256xf32>
    %3 = tpu.matmul %2, %1, %cst {dimension_numbers = #tpu.dot_dimension_numbers<[1], [0], [0], [1], [0, 0, 1, 1], [], []>} : vector<8x16xf32>, vector<16x256xf32>, vector<8x256xf32> -> vector<8x256xf32>
    %4 = tpu.iota {dimensions = array<i32: 1>} : vector<1x256xi32>
    %c256_i32 = arith.constant 256 : i32
    %5 = arith.muli %arg1, %c256_i32 : i32
    %6 = vector.broadcast %5 : i32 to vector<1x256xi32>
    %7 = arith.addi %6, %4 : vector<1x256xi32>
    %c256_i32_4 = arith.constant 256 : i32
    %8 = vector.broadcast %c256_i32_4 : i32 to vector<1x256xi32>
    %9 = arith.cmpi slt, %7, %8 : vector<1x256xi32>
    %c256_i32_5 = arith.constant 256 : i32
    %10 = arith.muli %arg1, %c256_i32_5 : i32
    %c256_i32_6 = arith.constant 256 : i32
    %11 = arith.subi %c256_i32_6, %10 : i32
    %c256_i32_7 = arith.constant 256 : i32
    %12 = arith.minsi %c256_i32_7, %11 : i32
    %13 = arith.sitofp %12 : i32 to f32
    %cst_8 = arith.constant 0.000000e+00 : f32
    %14 = vector.shape_cast %9 : vector<1x256xi1> to vector<1x256xi1>
    %15 = vector.broadcast %14 : vector<1x256xi1> to vector<8x256xi1>
    %16 = vector.broadcast %cst_8 : f32 to vector<8x256xf32>
    %17 = arith.select %15, %3, %16 : vector<8x256xi1>, vector<8x256xf32>
    %cst_9 = arith.constant dense<0.000000e+00> : vector<8xf32>
    %18 = vector.multi_reduction <add>, %17, %cst_9 [1] : vector<8x256xf32> to vector<8xf32>
    %19 = vector.shape_cast %18 : vector<8xf32> to vector<8x1xf32>
    %20 = vector.broadcast %13 : f32 to vector<8x1xf32>
    %21 = arith.divf %19, %20 : vector<8x1xf32>
    %22 = vector.broadcast %21 : vector<8x1xf32> to vector<8x256xf32>
    %23 = arith.subf %3, %22 : vector<8x256xf32>
    %cst_10 = arith.constant 0.000000e+00 : f32
    %24 = vector.shape_cast %9 : vector<1x256xi1> to vector<1x256xi1>
    %25 = vector.broadcast %24 : vector<1x256xi1> to vector<8x256xi1>
    %26 = vector.broadcast %cst_10 : f32 to vector<8x256xf32>
    %27 = arith.select %25, %23, %26 : vector<8x256xi1>, vector<8x256xf32>
    %28 = arith.mulf %27, %27 : vector<8x256xf32>
    %cst_11 = arith.constant dense<0.000000e+00> : vector<8xf32>
    %29 = vector.multi_reduction <add>, %28, %cst_11 [1] : vector<8x256xf32> to vector<8xf32>
    %30 = vector.shape_cast %29 : vector<8xf32> to vector<8x1xf32>
    %31 = vector.shape_cast %19 : vector<8x1xf32> to vector<1x1x8x1xf32>
    %c0_12 = arith.constant 0 : index
    %c0_13 = arith.constant 0 : index
    %c0_14 = arith.constant 0 : index
    %c0_15 = arith.constant 0 : index
    %32 = vector.load %arg4[%c0_12, %c0_13, %c0_14, %c0_15] : memref<1x1x8x1xf32, #tpu.memory_space<vmem>>, vector<1x1x8x1xf32>
    tpu.vector_store %arg4[%c0_12, %c0_13, %c0_14, %c0_15], %31 {strides = array<i32>} : memref<1x1x8x1xf32, #tpu.memory_space<vmem>>, vector<1x1x8x1xf32>,
    %33 = vector.shape_cast %30 : vector<8x1xf32> to vector<1x1x8x1xf32>
    %c0_16 = arith.constant 0 : index
    %c0_17 = arith.constant 0 : index
    %c0_18 = arith.constant 0 : index
    %c0_19 = arith.constant 0 : index
    %34 = vector.load %arg5[%c0_16, %c0_17, %c0_18, %c0_19] : memref<1x1x8x1xf32, #tpu.memory_space<vmem>>, vector<1x1x8x1xf32>
    tpu.vector_store %arg5[%c0_16, %c0_17, %c0_18, %c0_19], %33 {strides = array<i32>} : memref<1x1x8x1xf32, #tpu.memory_space<vmem>>, vector<1x1x8x1xf32>,
    return
  }
  func.func @transform_0(%arg0: i32, %arg1: i32) -> (i32, i32, i32) {
    %c0_i32 = arith.constant 0 : i32
    %c0_i32_0 = arith.constant 0 : i32
    return %arg0, %c0_i32, %arg1 : i32, i32, i32
  }
  func.func @transform_1(%arg0: i32, %arg1: i32) -> (i32, i32) {
    %c0_i32 = arith.constant 0 : i32
    %c0_i32_0 = arith.constant 0 : i32
    %c0_i32_1 = arith.constant 0 : i32
    return %c0_i32, %c0_i32_0 : i32, i32
  }
  func.func @transform_2(%arg0: i32, %arg1: i32) -> (i32, i32, i32, i32) {
    %c0_i32 = arith.constant 0 : i32
    %c0_i32_0 = arith.constant 0 : i32
    %c0_i32_1 = arith.constant 0 : i32
    return %arg0, %arg1, %c0_i32, %c0_i32_0 : i32, i32, i32, i32
  }
  func.func @transform_3(%arg0: i32, %arg1: i32) -> (i32, i32, i32, i32) {
    %c0_i32 = arith.constant 0 : i32
    %c0_i32_0 = arith.constant 0 : i32
    %c0_i32_1 = arith.constant 0 : i32
    return %arg0, %arg1, %c0_i32, %c0_i32_0 : i32, i32, i32, i32
  }
}

</mosaic_0001>

<bundles_post_ra>
// kernel: tpu_custom_call.1
= control target key start
LH: loop header
LB: loop body
LE: loop exit
PB: predicated region body
PF: predicated region fallthrough
CT: control target
= control target key end

     0   :  { %9 = vsyncpa [#allocation3], 0  ;;  %s902_s0 = inlined_call_operand.hbm [shape: f32[2,16,256], index: 0, kind: input, shape index: {}]   ;;  %s903_s1 = inlined_call_operand.hbm [shape: f32[8,16], index: 1, kind: input, shape index: {}]   ;;  %s904_s2 = inlined_call_operand.vmem [shape: f32[2,1,8,1], index: 2, kind: output, shape index: {0}]   ;;  %s905_s3 = inlined_call_operand.vmem [shape: f32[2,1,8,1], index: 3, kind: output, shape index: {1}]  }
   0x1   :  { %11 = vsyncpa [#allocation3 + $0x1], 0 }
   0x2   :  { %12 = vsyncpa [#allocation5], 0  ;;  %s729_s12 = smov 0   ;;  %s731_s13 = smov 0  }
   0x3   :  { %s733_s14 = smov 0   ;;  %s735_s15 = smov 0  }
   0x4   :  { %s737_s16 = smov 0   ;;  %s739_s17 = smov 0  }
   0x5 LB: > { %s500_s18 = sadd.s32 4294967295, %s702_s17   ;;  %s39_s19 = sadd.s32 1, %s690_s14  ;;  %s702_s17 = sphi %s739_s17, %s18_s17   ;;  %s698_s16 = sphi %s737_s16, %s925_s16   ;;  %s694_s15 = sphi %s735_s15, %s924_s15   ;;  %s690_s14 = sphi %s733_s14, %s923_s14   ;;  %s686_s13 = sphi %s731_s13, %s922_s13   ;;  %s682_s12 = sphi %s729_s12, %s921_s12  }
   0x6   : > { %p46_p0 = scmp.ne.s32.totalorder %s690_s14, %s686_s13  ;;  %p47_p1 = scmp.eq.s32.totalorder %s702_s17, 0 }
   0x7   : > { %p52_p2 = scmp.ne.s32.totalorder %s686_s13, %s682_s12  ;;  %p763_p3 = scmp.eq.s32.totalorder %s500_s18, 0 }
   0x8   : > { %p48_p4 = por %p47_p1, %p46_p0  ;;  %p502_p5 = scmp.ge.s32.totalorder %s702_s17, 1 }
   0x9   : > { %s911_s20 = scalar_select %p763_p3, 1, 0 }
   0xa   : > { %p770_p6 = por %p763_p3, %p52_p2  ;;  %p140_p7 = scmp.lt.s32.totalorder %s702_s17, 3 }
   0xb   : > { %s704_s23 = smov [#allocation4]   ;;  %p536_p10 = scmp.lt.s32.totalorder %s702_s17, 2 }
   0xc   : > { %s912_s21 = scalar_select %p770_p6, 1, 0 }
   0xd   : > { %p775_p8 = pnand %p502_p5, %p140_p7  ;;  %s153_s24 = sshll.u32 %s704_s23, 4  ;;  %s154_s24 = int_to_ptr.vmem [resolvable:$true] %s153_s24 }
   0xe   : > { %s164_s25 = sand.u32 1, %s690_s14   ;;  %p789_p12 = pnand %p536_p10, %p48_p4 }
   0xf   : > { %s913_s22 = scalar_select %p775_p8, 1, 0 }
  0x10   : > { %p527_p9 = pneg %p775_p8  ;;  %s590_s30 = scalar_lea.hbm %s903_s1, 128 }
  0x11   : > { %s915_s27 = scalar_select %p789_p12, 1, 0 }
  0x12   : > { %p785_p11 = pnand %p527_p9, %p763_p3  ;;  %p591_p13 = scmp.ne.s32.totalorder %s903_s1, %s590_s30 }
  0x13   : > { %p597_p5 = scmp.lt.u32.totalorder %s590_s30, %s903_s1 }
  0x14   : > { %p592_p0 = pneg %p785_p11 }
  0x16   : > { %p593_p1 = pnand %p592_p0, %p591_p13 }
  0x18   : > { %p594_p2 = pneg %p593_p1 }
  0x1a   : > { %p599_p4 = pnand %p597_p5, %p594_p2 }
  0x1c   : > { %602 = shalt.err (!%p599_p4)
}
  0x1d   : > { %s603_s8 = scalar_lea.vmem %s154_s24, 128  ;;  %p611_p3 = scmp.lt.s32.totalorder %s154_s24, %s154_s24 }
  0x1e   : > { %p604_p7 = scmp.ne.s32.totalorder %s154_s24, %s603_s8  ;;  %p612_p6 = scmp.lt.s32.totalorder %s603_s8, %s603_s8 }
  0x20   : > { %p606_p9 = pnand %p604_p7, %p592_p0  ;;  %p613_p8 = por %p612_p6, %p611_p3 }
  0x22   : > { %p607_p10 = pneg %p606_p9 }
  0x24   : > { %p614_p12 = pnand %p613_p8, %p607_p10 }
  0x26   : > { %617 = shalt.err (!%p614_p12)
}
  0x27   : > { %530 = dma.hbm_to_vmem [thread:$0]  (!%p785_p11), %s903_s1, 128, %s154_s24, [#allocation5]  }
  0x28   : > { %s30_s11 = sadd.s32 1, %s698_s16  ;;  %s505_s12 = sshll.u32 %s164_s25, 5 }
  0x29   : > { %p32_p13 = scmp.ge.s32.totalorder %s30_s11, 2  ;;  %s516_s18 = sshll.u32 %s698_s16, 9 }
  0x2a   : > { %s168_s23 = scalar_lea.vmem [#allocation2], %s505_s12  ;;  %s818_s30 = scalar_lea.hbm %s902_s0, %s516_s18 }
  0x2b   : > { %s177_s28 = sshll.u32 %s168_s23, 4  ;;  %s927_s11 = smov (%p32_p13, %s30_s11), 0  ;;  %s820_s28 = int_to_ptr.vmem [resolvable:$true] %s177_s28 }
  0x2c   : > { %s34_s24 = ssub.s32 %s698_s16, %s927_s11  ;;  %s830_s5 = scalar_lea.sflag [#allocation3], %s164_s25 }
  0x2d   : > { %p824_p3 = scmp.eq.s32.totalorder %s34_s24, 0  ;;  %s618_s6 = scalar_lea.hbm %s818_s30, 512 }
  0x2e   : > { %p619_p6 = scmp.ne.s32.totalorder %s818_s30, %s618_s6  ;;  %p917_p8 = scmp.ne.s32.totalorder %s915_s27, 0 }
  0x2f   : > { %s623_s9 = scalar_lea.hbm %s902_s0, 1024  ;;  %p624_p1 = scmp.lt.u32.totalorder %s818_s30, %s902_s0 }
  0x30   : > { %p620_p11 = pneg %p917_p8  ;;  %p625_p2 = scmp.lt.u32.totalorder %s623_s9, %s618_s6 }
  0x31   : > { %p627_p4 = scmp.lt.u32.totalorder %s618_s6, %s818_s30 }
  0x32   : > { %p621_p12 = pnand %p620_p11, %p619_p6  ;;  %p626_p5 = por %p625_p2, %p624_p1 }
  0x34   : > { %p622_p0 = pneg %p621_p12  ;;  %p628_p7 = por %p627_p4, %p626_p5 }
  0x36   : > { %p629_p9 = pnand %p628_p7, %p622_p0 }
  0x38   : > { %632 = shalt.err (!%p629_p9)
}
  0x39   : > { %s633_s25 = scalar_lea.vmem %s820_s28, 512  ;;  %s705_s18 = smov [#allocation2]  }
  0x3a   : > { %p634_p10 = scmp.ne.s32.totalorder %s820_s28, %s633_s25  ;;  %s638_s23 = sshll.u32 %s705_s18, 4  ;;  %s639_s23 = int_to_ptr.vmem [resolvable:$false] %s638_s23 }
  0x3b   : > { %s640_s26 = scalar_lea.vmem %s639_s23, 1024  ;;  %p641_p12 = scmp.lt.s32.totalorder %s820_s28, %s639_s23 }
  0x3c   : > { %p636_p13 = pnand %p634_p10, %p620_p11  ;;  %p642_p1 = scmp.lt.s32.totalorder %s640_s26, %s633_s25 }
  0x3e   : > { %p637_p6 = pneg %p636_p13  ;;  %p643_p2 = por %p642_p1, %p641_p12 }
  0x40   : > { %p644_p5 = pnand %p643_p2, %p637_p6 }
  0x42   : > { %647 = shalt.err (!%p644_p5)
}
  0x43   : > { %s706_s29 = smov 256   ;;  %s707_s24 = smov 16  }
  0x44   : > { %534 = dma.hbm_to_vmem [thread:$0]  (!%p917_p8), %s818_s30, 512, %s820_s28, %s830_s5, %s706_s29, %s706_s29, %s707_s24  }
  0x45   : > { %s863_s6 = scalar_select %p824_p3, %s690_s14, %s39_s19  }
  0x46   : > { %p918_p11 = scmp.ne.s32.totalorder %s913_s22, 0 }
  0x47   : > { %s191_s7 = sand.u32 (!%p918_p11), 1, %s686_s13   ;;  %p919_p0 = scmp.ne.s32.totalorder (!%p918_p11), %s912_s21, 0 }
  0x48   : > { %189 = sbr.rel (%p918_p11) target bundleno = 598 (0x256), region = 28  ;;  %s509_s8 = sshll.u32 (!%p918_p11), %s191_s7, 5 }
  0x49   : > { %s192_s9 = scalar_lea.sflag (!%p918_p11), [#allocation3], %s191_s7  ;;  %s195_s10 = scalar_lea.vmem (!%p918_p11), [#allocation2], %s509_s8 }
  0x4f   : > { %673 = dma.done.wait (%p919_p0), %s192_s9, 512  }
  0x50   : > { %675 = vsyncadd (%p919_p0), %s192_s9, 4294966784  ;;  %p920_p8 = scmp.ne.s32.totalorder %s911_s20, 0 }
  0x52   : > { %677 = dma.done.wait (%p920_p8), [#allocation5], 128  }
  0x53   : > { %679 = vsyncadd (%p920_p8), [#allocation5], 4294967168  ;;  %v708_v0 = vmov 0.0   ;;  %v247_v1 = vld [vmem:[%s195_s10 + $0x8] sm:$0xff]  ;;  %v249_v2 = vld [vmem:[%s195_s10 + $0x18] sm:$0xff]  ;;  %vm251_vm0 = vcmask 130048  }
  0x54   : > { %319 = vmatprep.mubr.f32.mxu0 %v708_v0  ;;  %v246_v3 = vld [vmem:[%s195_s10] sm:$0xff]  ;;  %v517_v4 = vpack.c.bf16 %v249_v2, %v247_v1  ;;  %v248_v5 = vld [vmem:[%s195_s10 + $0x10] sm:$0xff]  ;;  %p232_p3 = scmp.lt.s32.totalorder %s694_s15, 1  ;;  %vm360_vm1 = vcmask 7168  }
  0x55   : > { %v519_v6 = vpack.c.bf16 %v248_v5, %v246_v3  ;;  %v250_v7 = vld [vmem:[#allocation4] sm:$0xff] }
  0x56   : > { %518 = vmatprep.subr.bf16.mxu0 %v517_v4  ;;  %s929_s15 = smov (!%p232_p3, %s694_s15), 1 }
  0x57   : > { %520 = vmatpush1.bf16.msra.mxu0 %v519_v6  ;;  %s511_s19 = sshll.u32 %s929_s15, 3 }
  0x58   : > { %s238_s22 = scalar_lea.vmem %s904_s2, %s511_s19  ;;  %s245_s30 = scalar_lea.vmem %s905_s3, %s511_s19 }
  0x5a   : > { %513 = vmatmul.mubr.msk.f32.vlgmr.msra.gmra.mrb[0].mxu0 %vm251_vm0, %v250_v7 }
 0x12d   : > { %v321_v8 = vpop.f32.mrb[0].mxu0 }
 0x12e   : > { %v323_v9 = vpop.f32.mrb[1].mxu0 }
 0x12f   : > { %v345_v10 = vadd.f32 %v323_v9, %v321_v8 }
 0x131   : > { %346 = vadd.xlane.f32.xlu0 %v345_v10 }
 0x1be   : > { %v347_v11 = vpop.xlane.xlu0 %346 }
 0x1bf   : > { %v350_v12 = vmul.f32 0.00390625, %v347_v11  ;;  %361 = vst.msk [vmem:[%s238_s22] sm:$0xff] %vm360_vm1, %v347_v11 }
 0x1c1   : > { %v351_v13 = vsub.f32 %v321_v8, %v350_v12  ;;  %v352_v14 = vsub.f32 %v323_v9, %v350_v12 }
 0x1c3   : > { %v355_v15 = vmul.f32 %v351_v13, %v351_v13  ;;  %v356_v16 = vmul.f32 %v352_v14, %v352_v14 }
 0x1c5   : > { %v357_v17 = vadd.f32 %v356_v16, %v355_v15 }
 0x1c7   : > { %358 = vadd.xlane.f32.xlu0 %v357_v17 }
 0x254   : > { %v359_v18 = vpop.xlane.xlu0 %358 }
 0x255   : > { %362 = vst.msk [vmem:[%s245_s30] sm:$0xff] %vm360_vm1, %v359_v18 }
 0x256 PF: > { %s18_s17 = sadd.s32 1, %s702_s17   ;;  %s921_s12 = smov %s686_s13 }
 0x257   : > { %p15_p4 = scmp.ge.s32.totalorder %s18_s17, 4   ;;  %s922_s13 = smov %s690_s14 }
 0x258   : > { %s923_s14 = smov %s863_s6  ;;  %s924_s15 = smov %s698_s16 }
 0x259   : > { %s925_s16 = smov %s927_s11  ;;  %17 = sbr.rel (!%p15_p4) target bundleno = 5 (0x5), region = 84 }
 0x260   :  { %408 = vsyncpa [#allocation3], 1 }
 0x261   :  { %410 = vsyncpa [#allocation3 + $0x1], 1 }
 0x262   :  { %411 = vsyncpa [#allocation5], 1 }

</bundles_post_ra>
